<compile_context>
chip_gen: v7x
topology: tpu7x:2x2x1
jax: 0.10.0
libtpu: 0.0.40
codegen_flags: <defaults>
</compile_context>

<pallas_src>
import jax
import jax.numpy as jnp
from jax import lax
from jax.experimental import pallas as pl
from jax.experimental.pallas import tpu as pltpu


def _vmem_capacity_bytes(default: int = 64 * 1024 * 1024) -> int:
    """Physical VMEM per TensorCore; conservative (v7x) default if the query fails."""
    try:
        return int(pltpu.get_tpu_info().vmem_capacity_bytes)
    except Exception:  # off-TPU tracing / older runtimes
        return default


def _make_avg_readout_kernel(divisor, tn, last_rows, chunk, out_dtype):
    """Kernel over a (TB, TN, TD) input tile and (TB, TD) output tile.

    `divisor` is the full (original) sequence length; `tn` the rows in a full
    reduction tile; `last_rows` the valid rows in the last reduction tile
    (== tn when the grid divides N evenly); `chunk` the accumulator depth.
    """
    inv_n = 1.0 / float(divisor)
    ragged = last_rows != tn

    def _accumulate(seq_ref, acc_ref, n_rows):
        n_full = n_rows // chunk
        tail = n_rows % chunk          # > 0 only on the ragged last tile

        def add_chunk(c, carry):
            start = c * chunk
            if not isinstance(start, int):
                start = pl.multiple_of(start, chunk)
            acc_ref[...] += seq_ref[:, pl.ds(start, chunk), :].astype(jnp.float32)
            return carry

        if n_full == 1:
            add_chunk(0, 0)
        elif n_full > 1:
            # Unrolled straight-line body so the adds hide under the HBM stream.
            lax.fori_loop(0, n_full, add_chunk, 0,
                          unroll=True if n_full <= 8 else 4)

        if tail > 0:
            # Tail chunk of the ragged last tile: rows >= n_rows hold garbage
            # from the partial HBM block.  `tail` is static, so this single
            # iota+select runs once, only here (full tiles stay mask-free).
            start = n_full * chunk              # static; start + chunk <= tn
            blk = seq_ref[:, pl.ds(start, chunk), :].astype(jnp.float32)
            row = lax.broadcasted_iota(jnp.int32, blk.shape, 1)
            acc_ref[...] += jnp.where(row < tail, blk, 0.0)

    def kernel(seq_ref, out_ref, acc_ref):
        k = pl.program_id(2)
        num_k = pl.num_programs(2)

        @pl.when(k == 0)
        def _init():
            acc_ref[...] = jnp.zeros_like(acc_ref)

        if not ragged:
            _accumulate(seq_ref, acc_ref, tn)
        else:
            @pl.when(k < num_k - 1)
            def _full_tiles():
                _accumulate(seq_ref, acc_ref, tn)

            @pl.when(k == num_k - 1)
            def _last_tile():
                _accumulate(seq_ref, acc_ref, last_rows)

        @pl.when(k == num_k - 1)
        def _finalize():
            # Single cross-sublane reduce + scale, once per output tile.
            out_ref[...] = (jnp.sum(acc_ref[...], axis=1) * inv_n).astype(out_dtype)

    return kernel


def _avg_pallas(x, *, divisor, out_dtype):
    """(B, N, D) -> (B, D): sum over axis 1 divided by `divisor` (f32 accumulation)."""
    B, N, D = x.shape
    itemsize = jnp.dtype(x.dtype).itemsize
    out_itemsize = jnp.dtype(out_dtype).itemsize

    # Generation-aware budgets.
    vmem_cap = _vmem_capacity_bytes()
    small_vmem = vmem_cap < (100 << 20)          # v7x-class: 64 MiB per TC
    tile_budget = (12 << 20) if small_vmem else (16 << 20)

    # Batch rows per step: sublane-dense output stores (16 rows for bf16 packing).
    tb = 16 if jnp.dtype(out_dtype) == jnp.dtype(jnp.bfloat16) else 8
    TB = B if B < tb else tb

    # Feature (lane) tiling.  TD is either the full D or a multiple of 128; a
    # ragged last D tile is safe (garbage lanes only feed dropped output lanes).
    if D > 512:
        TD = 512
    elif (pl.cdiv(B, TB) == 1 and D >= 256 and D % 256 == 0
          and B * N * D * itemsize >= (4 << 20)):
        TD = D // 2                    # give the second TensorCore (v7x) work
    else:
        TD = D

    # Reduction tiling: biggest multiple-of-8 N tile within the VMEM budget.
    tn_cap = max(8, (tile_budget // max(1, TB * TD * itemsize)) // 8 * 8)
    if N <= 8:
        TN = N
    elif N <= tn_cap and N % 8 == 0:
        TN = N
    else:
        TN = min(tn_cap, (N // 8) * 8)

    CHUNK = min(8, TN)
    ragged = (N % TN) != 0
    last_rows = (N % TN) if ragged else TN

    grid = (pl.cdiv(B, TB), pl.cdiv(D, TD), pl.cdiv(N, TN))
    kernel = _make_avg_readout_kernel(divisor, TN, last_rows, CHUNK, out_dtype)

    # Scoped VMEM: 2x double-buffered input tile + 2x output tile + accumulator
    # + headroom, capped below physical (48 MiB on v7x-class, 96 MiB otherwise).
    in_tile = TB * TN * TD * itemsize
    out_tile = TB * TD * out_itemsize
    acc_bytes = TB * CHUNK * TD * 4
    need = 2 * in_tile + 2 * out_tile + acc_bytes + (4 << 20)
    cap = (48 << 20) if small_vmem else (96 << 20)
    vmem_limit = int(min(cap, max(16 << 20, need)))

    cost = pl.CostEstimate(
        flops=B * N * D,
        transcendentals=0,
        bytes_accessed=B * N * D * itemsize + B * D * out_itemsize,
    )

    return pl.pallas_call(
        kernel,
        out_shape=jax.ShapeDtypeStruct((B, D), out_dtype),
        grid_spec=pltpu.PrefetchScalarGridSpec(
            num_scalar_prefetch=0,
            grid=grid,
            in_specs=[pl.BlockSpec((TB, TN, TD), lambda b, d, k: (b, k, d))],
            out_specs=pl.BlockSpec((TB, TD), lambda b, d, k: (b, d)),
            scratch_shapes=[pltpu.VMEM((TB, CHUNK, TD), jnp.float32)],
        ),
        compiler_params=pltpu.CompilerParams(
            dimension_semantics=("parallel", "parallel", "arbitrary"),
            vmem_limit_bytes=vmem_limit,
        ),
        cost_estimate=cost,
    )(x)


def avg_readout(seq: jax.Array) -> jax.Array:
    """Pallas TPU implementation of torch.mean(seq, 1) for seq of shape (B, N, D)."""
    if seq.ndim != 3:
        raise ValueError("avg_readout expects a (batch, seq, features) input")
    B, N, D = seq.shape
    orig_dtype = seq.dtype

    # Lane-density fold for small D: pack g = 128//D consecutive N rows into the
    # lane dimension (free row-major reshape), reduce the folded sequence in the
    # kernel (f32 partials), then finish with a tiny (B, g, D) sum in XLA.
    fold = 1
    if D < 128:
        g = 128 // D
        if g >= 2 and N % g == 0:      # only when the reshape is free (no padding)
            fold = g

    if fold > 1:
        folded = _avg_pallas(seq.reshape(B, N // fold, fold * D),
                             divisor=N, out_dtype=jnp.float32)
        return folded.reshape(B, fold, D).sum(axis=1).astype(orig_dtype)

    return _avg_pallas(seq, divisor=N, out_dtype=orig_dtype)


if __name__ == "__main__":
    key = jax.random.PRNGKey(0)
    keys = jax.random.split(key, 4)

    # Shapes consistent with the module (graph readout): batch=2, nodes=8, hidden=32.
    B, N, D = 2, 8, 32
    seq = jax.random.normal(keys[0], (B, N, D), dtype=jnp.float32)
    out = jax.block_until_ready(avg_readout(seq))
    ref = jnp.mean(seq, axis=1)
    assert out.shape == (B, D)
    assert jnp.allclose(out, ref, atol=1e-5, rtol=1e-5)

    # Partial batch tile + multi-chunk accumulation.
    seq2 = jax.random.normal(keys[1], (9, 16, 128), dtype=jnp.float32)
    out2 = jax.block_until_ready(avg_readout(seq2))
    assert jnp.allclose(out2, jnp.mean(seq2, axis=1), atol=1e-5, rtol=1e-5)

    # Ragged reduction tiling (N % 8 != 0) -> masked tail chunk on the last tile.
    seq3 = jax.random.normal(keys[2], (3, 13, 128), dtype=jnp.float32)
    out3 = jax.block_until_ready(avg_readout(seq3))
    assert jnp.allclose(out3, jnp.mean(seq3, axis=1), atol=1e-5, rtol=1e-5)

    # bf16 input: f32 accumulation in-kernel, bf16 output.
    seq4 = jax.random.normal(keys[3], (5, 12, 256), dtype=jnp.bfloat16)
    out4 = jax.block_until_ready(avg_readout(seq4))
    ref4 = jnp.mean(seq4.astype(jnp.float32), axis=1)
    assert jnp.allclose(out4.astype(jnp.float32), ref4, atol=2e-2, rtol=2e-2)

    print("KERNEL_OK")
</pallas_src>

<mosaic_0001>
module attributes {stable_mosaic.version = 11 : i64} {
  func.func @kernel(%arg0: i32, %arg1: i32, %arg2: i32, %arg3: memref<2x2x128xf32, #tpu.memory_space<vmem>>, %arg4: memref<2x128xf32, #tpu.memory_space<vmem>>, %arg5: memref<2x2x128xf32, #tpu.memory_space<vmem>>) attributes {dimension_semantics = [#tpu.dimension_semantics<parallel>, #tpu.dimension_semantics<parallel>, #tpu.dimension_semantics<arbitrary>], iteration_bounds = array<i64: 1, 1, 1>, scalar_prefetch = 0 : i64, scratch_operands = 1 : i64, tpu.core_type = #tpu.core_type<tc>, window_params = [{transform_indices = @transform_0, window_bounds = array<i64: 2, 2, 128>}, {transform_indices = @transform_1, window_bounds = array<i64: 2, 128>}]} {
    %c0_i32 = arith.constant 0 : i32
    %0 = arith.cmpi eq, %arg2, %c0_i32 : i32
    %1 = arith.extui %0 : i1 to i32
    %c0_i32_0 = arith.constant 0 : i32
    %2 = arith.cmpi ne, %1, %c0_i32_0 : i32
    scf.if %2 {
      %cst = arith.constant 0.000000e+00 : f32
      %10 = vector.broadcast %cst : f32 to vector<2x2x128xf32>
      %c0_11 = arith.constant 0 : index
      %c0_12 = arith.constant 0 : index
      %c0_13 = arith.constant 0 : index
      %11 = vector.load %arg5[%c0_11, %c0_12, %c0_13] : memref<2x2x128xf32, #tpu.memory_space<vmem>>, vector<2x2x128xf32>
      tpu.vector_store %arg5[%c0_11, %c0_12, %c0_13], %10 {strides = array<i32>} : memref<2x2x128xf32, #tpu.memory_space<vmem>>, vector<2x2x128xf32>,
    } else {
    }
    %c0 = arith.constant 0 : index
    %c0_1 = arith.constant 0 : index
    %c0_2 = arith.constant 0 : index
    %3 = vector.load %arg5[%c0, %c0_1, %c0_2] : memref<2x2x128xf32, #tpu.memory_space<vmem>>, vector<2x2x128xf32>
    %c0_3 = arith.constant 0 : index
    %c0_4 = arith.constant 0 : index
    %c0_5 = arith.constant 0 : index
    %4 = vector.load %arg3[%c0_3, %c0_4, %c0_5] : memref<2x2x128xf32, #tpu.memory_space<vmem>>, vector<2x2x128xf32>
    %5 = arith.addf %3, %4 : vector<2x2x128xf32>
    %c0_6 = arith.constant 0 : index
    %c0_7 = arith.constant 0 : index
    %c0_8 = arith.constant 0 : index
    %6 = vector.load %arg5[%c0_6, %c0_7, %c0_8] : memref<2x2x128xf32, #tpu.memory_space<vmem>>, vector<2x2x128xf32>
    tpu.vector_store %arg5[%c0_6, %c0_7, %c0_8], %5 {strides = array<i32>} : memref<2x2x128xf32, #tpu.memory_space<vmem>>, vector<2x2x128xf32>,
    %c0_i32_9 = arith.constant 0 : i32
    %7 = arith.cmpi eq, %arg2, %c0_i32_9 : i32
    %8 = arith.extui %7 : i1 to i32
    %c0_i32_10 = arith.constant 0 : i32
    %9 = arith.cmpi ne, %8, %c0_i32_10 : i32
    scf.if %9 {
      %c0_11 = arith.constant 0 : index
      %c0_12 = arith.constant 0 : index
      %c0_13 = arith.constant 0 : index
      %10 = vector.load %arg5[%c0_11, %c0_12, %c0_13] : memref<2x2x128xf32, #tpu.memory_space<vmem>>, vector<2x2x128xf32>
      %cst = arith.constant dense<0.000000e+00> : vector<2x128xf32>
      %11 = vector.multi_reduction <add>, %10, %cst [1] : vector<2x2x128xf32> to vector<2x128xf32>
      %cst_14 = arith.constant 1.250000e-01 : f32
      %12 = vector.broadcast %cst_14 : f32 to vector<2x128xf32>
      %13 = arith.mulf %11, %12 : vector<2x128xf32>
      %c0_15 = arith.constant 0 : index
      %c0_16 = arith.constant 0 : index
      %14 = vector.load %arg4[%c0_15, %c0_16] : memref<2x128xf32, #tpu.memory_space<vmem>>, vector<2x128xf32>
      tpu.vector_store %arg4[%c0_15, %c0_16], %13 {strides = array<i32>} : memref<2x128xf32, #tpu.memory_space<vmem>>, vector<2x128xf32>,
    } else {
    }
    return
  }
  func.func @transform_0(%arg0: i32, %arg1: i32, %arg2: i32) -> (i32, i32, i32) {
    %c0_i32 = arith.constant 0 : i32
    return %arg0, %arg2, %arg1 : i32, i32, i32
  }
  func.func @transform_1(%arg0: i32, %arg1: i32, %arg2: i32) -> (i32, i32) {
    %c0_i32 = arith.constant 0 : i32
    return %arg0, %arg1 : i32, i32
  }
}

</mosaic_0001>

<bundles_post_ra>
// kernel: tpu_custom_call.1
= control target key start
LH: loop header
LB: loop body
LE: loop exit
PB: predicated region body
PF: predicated region fallthrough
CT: control target
= control target key end

     0   :  { %6 = vsyncpa [#allocation4], 0  ;;  %s172_s0 = inlined_call_operand.hbm [shape: f32[2,2,128], index: 0, kind: input, shape index: {}]   ;;  %s173_s1 = inlined_call_operand.hbm [shape: f32[2,128], index: 1, kind: output, shape index: {}]  }
   0x1   :  { %7 = vsyncpa [#allocation5], 0  ;;  %s133_s6 = smov [#allocation3]   ;;  %s85_s10 = scalar_lea.hbm %s172_s0, 64 }
   0x2   :  { %s13_s7 = sshll.u32 %s133_s6, 4  ;;  %p86_p0 = scmp.ne.s32.totalorder %s172_s0, %s85_s10  ;;  %s14_s7 = int_to_ptr.vmem [resolvable:$true] %s13_s7 }
   0x3   :  { %p89_p1 = scmp.lt.u32.totalorder %s85_s10, %s172_s0 }
   0x5   :  { %p91_p2 = pnand %p89_p1, %p86_p0 }
   0x7   :  { %94 = shalt.err (!%p91_p2)
}
   0x8   :  { %s95_s15 = scalar_lea.vmem %s14_s7, 64  ;;  %p100_p4 = scmp.lt.s32.totalorder %s14_s7, %s14_s7 }
   0x9   :  { %p96_p3 = scmp.ne.s32.totalorder %s14_s7, %s95_s15  ;;  %p101_p5 = scmp.lt.s32.totalorder %s95_s15, %s95_s15 }
   0xb   :  { %p102_p6 = por %p101_p5, %p100_p4 }
   0xd   :  { %p103_p7 = pnand %p102_p6, %p96_p3 }
   0xf   :  { %106 = shalt.err (!%p103_p7)
}
  0x10   :  { %s134_s16 = smov 32   ;;  %s135_s17 = smov 2  }
  0x11   :  { %19 = dma.hbm_to_vmem [thread:$0]  %s172_s0, 64, %s14_s7, [#allocation4], %s134_s16, %s134_s16, %s135_s17  }
  0x12   :  { %129 = dma.done.wait [#allocation4], 64  }
  0x13   :  { %130 = vsyncadd [#allocation4], 4294967232  ;;  %v136_v0 = vmov 0.0   ;;  %v31_v1 = vld [vmem:[#allocation3] sm:$0x3]  ;;  %vm42_vm0 = vcmask 1041408  }
  0x14   :  { %27 = vst [vmem:[#allocation2] sm:$0x3] %v136_v0  ;;  %28 = vst [vmem:[#allocation2 + $0x2] sm:$0x3] %v136_v0  ;;  %v32_v2 = vld [vmem:[#allocation3 + $0x2] sm:$0x3] }
  0x15   :  { %s137_s0 = smov [#allocation6]   ;;  %vm61_vm1 = vcmask 1041409  }
  0x16   :  { %s71_s20 = sshll.u32 %s137_s0, 4  ;;  %s72_s20 = int_to_ptr.vmem [resolvable:$true] %s71_s20 }
  0x17   :  { %s107_s21 = scalar_lea.vmem %s72_s20, 32  ;;  %p112_p9 = scmp.lt.s32.totalorder %s72_s20, %s72_s20 }
  0x18   :  { %p108_p8 = scmp.ne.s32.totalorder %s72_s20, %s107_s21  ;;  %p113_p10 = scmp.lt.s32.totalorder %s107_s21, %s107_s21 }
  0x1a   :  { %p114_p11 = por %p113_p10, %p112_p9 }
  0x1b   :  { %v29_v3 = vld [vmem:[#allocation2] sm:$0x3]  ;;  %v30_v4 = vld [vmem:[#allocation2 + $0x2] sm:$0x3] }
  0x1c   :  { %v33_v5 = vadd.f32 %v31_v1, %v29_v3  ;;  %v34_v6 = vadd.f32 %v32_v2, %v30_v4  ;;  %p115_p12 = pnand %p114_p11, %p108_p8 }
  0x1e   :  { %35 = vst [vmem:[#allocation2] sm:$0x3] %v33_v5  ;;  %36 = vst [vmem:[#allocation2 + $0x2] sm:$0x3] %v34_v6 }
  0x25   :  { %v40_v7 = vld [vmem:[#allocation2] sm:$0x3]  ;;  %v41_v8 = vld [vmem:[#allocation2 + $0x2] sm:$0x3] }
  0x26   :  { %v43_v9 = vsel %vm42_vm0, %v40_v7, 0.0  ;;  %v50_v10 = vsel %vm42_vm0, %v41_v8, 0.0 }
  0x27   :  { %v44_v11 = vrot.slane %v43_v9, 4  ;;  %v51_v12 = vrot.slane %v50_v10, 4 }
  0x29   :  { %v45_v13 = vadd.f32 %v44_v11, %v43_v9  ;;  %v52_v14 = vadd.f32 %v51_v12, %v50_v10 }
  0x2b   :  { %v46_v15 = vrot.slane %v45_v13, 2  ;;  %v53_v16 = vrot.slane %v52_v14, 2 }
  0x2d   :  { %v47_v17 = vadd.f32 %v46_v15, %v45_v13  ;;  %v54_v18 = vadd.f32 %v53_v16, %v52_v14 }
  0x2f   :  { %v48_v19 = vrot.slane %v47_v17, 1  ;;  %v55_v20 = vrot.slane %v54_v18, 1 }
  0x31   :  { %v49_v21 = vadd.f32 %v48_v19, %v47_v17  ;;  %v56_v22 = vadd.f32 %v55_v20, %v54_v18 }
  0x33   :  { %v57_v23 = vmul.f32 0.125, %v49_v21  ;;  %v58_v24 = vmul.f32 0.125, %v56_v22 }
  0x35   :  { %v62_v25 = vsel %vm61_vm1, %v58_v24, %v57_v23 }
  0x36   :  { %64 = vst [vmem:[#allocation6] sm:$0x3] %v62_v25 }
  0x37   :  { %118 = shalt.err (!%p115_p12)
}
  0x38   :  { %s119_s24 = scalar_lea.hbm %s173_s1, 32 }
  0x39   :  { %p120_p13 = scmp.ne.s32.totalorder %s173_s1, %s119_s24  ;;  %p123_p0 = scmp.lt.u32.totalorder %s119_s24, %s173_s1 }
  0x3b   :  { %p125_p1 = pnand %p123_p0, %p120_p13 }
  0x3d   :  { %128 = shalt.err (!%p125_p1)
}
  0x3e   :  { %74 = dma.vmem_to_hbm [thread:$0]  %s72_s20, 32, %s173_s1, [#allocation5]  }
  0x3f   :  { %131 = dma.done.wait [#allocation5], 32  }
  0x40   :  { %132 = vsyncadd [#allocation5], 4294967264 }
  0x41   :  { %78 = vsyncpa [#allocation4], 1 }
  0x42   :  { %79 = vsyncpa [#allocation5], 1 }

</bundles_post_ra>
